<compile_context>
chip_gen: v7x
topology: tpu7x:2x2x1
jax: 0.10.0
libtpu: 0.0.40
codegen_flags: <defaults>
</compile_context>

<pallas_src>
import math

import jax
import jax.numpy as jnp
from jax.experimental import pallas as pl
from jax.experimental.pallas import tpu as pltpu


# ---------------------------------------------------------------------------
# Kernel
# ---------------------------------------------------------------------------
def _make_kernel(n_valid: int, n_tile: int):
    """Builds the kernel body; n_valid/n_tile are static (Python) values."""
    mask_needed = (n_valid % n_tile) != 0

    def kernel(x_ref, wv_ref, ws_ref, bv_ref, bs_ref, scls_ref, vcls_ref,
               e_ref, wot_ref, bo_ref, o_ref, m_sc, l_sc, acc_sc):
        Bt, nt, D = x_ref.shape
        H = e_ref.shape[0]
        n_idx = pl.program_id(1)
        n_last = pl.num_programs(1) - 1

        @pl.when(n_idx == 0)
        def _init():
            # CLS token's own key/value contribution seeds the online softmax:
            # m = s_cls, l = exp(s_cls - m) = 1, acc = 1 * v_cls (per head lane).
            m_sc[...] = jnp.broadcast_to(scls_ref[...], (Bt, H))
            l_sc[...] = jnp.ones((Bt, H), jnp.float32)
            acc_sc[...] = jnp.broadcast_to(vcls_ref[...], (Bt, D))

        x2 = x_ref[...].reshape(Bt * nt, D)

        # Two separate dots (no fused (Bt*nt, D+H) temp + slice copies).
        v = jnp.dot(x2, wv_ref[...], preferred_element_type=jnp.float32) + bv_ref[...]
        s = (jnp.dot(x2, ws_ref[...], preferred_element_type=jnp.float32)
             + bs_ref[...]).reshape(Bt, nt, H)                    # already 1/sqrt(hd) scaled

        if mask_needed:
            # Padded N rows (last tile only): kill their scores -> p = 0.
            row = n_idx * nt + jax.lax.broadcasted_iota(jnp.int32, (Bt, nt, H), 1)
            s = jnp.where(row < n_valid, s, jnp.float32(-1e30))

        # Online softmax update (all f32 on the VPU/EUP).
        m_prev = m_sc[...]
        m_new = jnp.maximum(m_prev, jnp.max(s, axis=1))            # (Bt, H)
        alpha = jnp.exp(m_prev - m_new)                            # (Bt, H)
        p = jnp.exp(s - m_new[:, None, :])                         # (Bt, nt, H)
        l_sc[...] = alpha * l_sc[...] + jnp.sum(p, axis=1)

        # Broadcast per-head quantities to that head's hd lanes via the 0/1
        # expansion matrix E (H, D): tiny matmuls instead of lane permutes.
        E = e_ref[...]
        pfull = jnp.dot(p.reshape(Bt * nt, H).astype(E.dtype), E,
                        preferred_element_type=jnp.float32)        # (Bt*nt, D)
        alpha_full = jnp.dot(alpha.astype(E.dtype), E,
                             preferred_element_type=jnp.float32)   # (Bt, D)
        acc_sc[...] = (alpha_full * acc_sc[...]
                       + jnp.sum((pfull * v).reshape(Bt, nt, D), axis=1))
        m_sc[...] = m_new

        @pl.when(n_idx == n_last)
        def _finalize():
            inv = pl.reciprocal(
                jnp.dot(l_sc[...].astype(E.dtype), E, preferred_element_type=jnp.float32),
                approx=True)
            attn = acc_sc[...] * inv                               # (Bt, D)
            out = jnp.dot(attn.astype(wot_ref.dtype), wot_ref[...],
                          preferred_element_type=jnp.float32) + bo_ref[...]
            o_ref[...] = out.astype(o_ref.dtype)                   # lane-dense (Bt, D) store

    return kernel


# ---------------------------------------------------------------------------
# VMEM-budgeted tiling
# ---------------------------------------------------------------------------
def _round_up(x, m):
    return ((x + m - 1) // m) * m


def _round_down(x, m):
    return (x // m) * m


def _vmem_limit_bytes():
    """~0.8 * physical VMEM: ~100 MiB on v5e/v6e, ~51 MiB on v7x."""
    try:
        cap = int(pltpu.get_tpu_info().vmem_capacity_bytes)
        if cap <= 0:
            raise ValueError
    except Exception:
        cap = 64 << 20  # conservative fallback (v7x per-core VMEM)
    return min(int(cap * 0.8), 110 << 20)


def _choose_tiles(B, N, D, H, x_bytes, w_bytes, vmem_limit):
    """Pick (b_tile, n_tile, padded_B, padded_N) that fit the VMEM budget."""
    Bp0 = _round_up(B, 8)

    # Resident weights, single-buffered via pl.Buffered(1): Wv^T, Wo^T, Ws, E + biases.
    weight_bytes = (2 * D * D + 2 * H * D) * w_bytes + (3 * D + 3 * H) * 4
    # Per x row: double-buffered x block + ~4 x-sized f32 temporaries (v, pfull,
    # pfull*v, reshape copies) + small per-head score temps.
    per_row = 2 * D * x_bytes + 4 * D * 4 + 4 * H * 4
    headroom = 2 << 20
    budget = max(vmem_limit - weight_bytes - headroom, 8 * per_row)
    max_rows = max(budget // per_row, 8)

    if max_rows >= 8 * N:
        # Whole N fits alongside at least an 8-row batch tile: no N tiling, no masking.
        n_tile = N
        bcap = min(Bp0, max(_round_down(max_rows // N, 8), 8))
    else:
        # N tiling (flash-style online softmax over the second grid axis).
        bcap = 8
        n_tile = min(_round_up(N, 8), max(_round_down(max_rows // 8, 8), 8))

    # Split the padded batch into equal-ish multiple-of-8 tiles no bigger than bcap.
    n_b_steps = -(-Bp0 // bcap)
    b_tile = _round_up(-(-Bp0 // n_b_steps), 8)
    # v7x has 2 TensorCores: if everything landed in a single parallel step but the
    # batch is big enough, halve the tile so the grid can be sharded across cores.
    if Bp0 // b_tile <= 1 and b_tile >= 16:
        b_tile = max(_round_down(b_tile // 2, 8), 8)

    Bp = _round_up(Bp0, b_tile)
    Np = _round_up(N, n_tile)
    return b_tile, n_tile, Bp, Np


# ---------------------------------------------------------------------------
# Wrapper
# ---------------------------------------------------------------------------
def attention_pool(tokens, cls_token, in_proj_w, in_proj_b, out_proj_w, out_proj_b,
                   num_heads: int, compute_dtype=jnp.bfloat16):
    """CLS-query attention pooling (== AttentionPool.forward).

    All algebraic folding is done in f32; only the MXU operands are cast to
    `compute_dtype` (bf16 by default, f32 available for tight numerical checks).
    """
    B, N, D = tokens.shape
    H = num_heads
    assert D % H == 0, "token_dim must be divisible by num_heads"
    hd = D // H
    scale = 1.0 / math.sqrt(hd)
    f32 = jnp.float32
    cd = jnp.dtype(compute_dtype)

    wq = in_proj_w[:D].astype(f32)
    wk = in_proj_w[D:2 * D].astype(f32)
    wv = in_proj_w[2 * D:].astype(f32)
    bq = in_proj_b[:D].astype(f32)
    bk = in_proj_b[D:2 * D].astype(f32)
    bv = in_proj_b[2 * D:].astype(f32)
    cls = cls_token.reshape(1, D).astype(f32)

    # Batch-independent CLS query with the 1/sqrt(hd) scale folded in, then fold the
    # K projection into a single (D, H) score matrix:
    #   score[n, h] = (x[n] @ Wk^T + bk) . q_h  ==  x[n] @ ws[:, h] + bs[h]
    q = (cls @ wq.T + bq) * scale                                      # (1, D)
    head_id = jnp.arange(D, dtype=jnp.int32) // hd
    onehot = head_id[None, :] == jnp.arange(H, dtype=jnp.int32)[:, None]   # (H, D)
    qmask = jnp.where(onehot, q, 0.0)                                  # (H, D)
    ws = wk.T @ qmask.T                                                # (D, H)
    bs = (qmask @ bk).reshape(1, H)                                    # (1, H), f32

    # CLS also participates as key / value (the [cls; tokens] concat is never built).
    k_cls = cls @ wk.T + bk
    v_cls = (cls @ wv.T + bv).astype(f32)                              # (1, D)
    s_cls = (k_cls @ qmask.T).astype(f32)                              # (1, H)

    # MXU operands in compute_dtype, everything else in f32.
    wv_t = wv.T.astype(cd)                                             # (D, D)
    ws_c = ws.astype(cd)                                               # (D, H)
    wot = out_proj_w.astype(f32).T.astype(cd)                          # (D, D)
    expand = onehot.astype(cd)                                         # (H, D)
    bv_r = bv.reshape(1, D)                                            # (1, D), f32
    bo = out_proj_b.astype(f32).reshape(1, D)                          # (1, D), f32
    x = tokens.astype(cd)

    # Generation-aware, VMEM-budgeted tiling.
    vmem_limit = _vmem_limit_bytes()
    b_tile, n_tile, Bp, Np = _choose_tiles(B, N, D, H, cd.itemsize, cd.itemsize,
                                           vmem_limit)
    pad_b, pad_n = Bp - B, Np - N
    if pad_b or pad_n:
        x = jnp.pad(x, ((0, pad_b), (0, pad_n), (0, 0)))

    kernel = _make_kernel(N, n_tile)
    c0 = lambda b, n: (0, 0)
    # Constant-index operands: single-buffered (double-buffering buys nothing here).
    wspec = lambda shape: pl.BlockSpec(shape, c0, pipeline_mode=pl.Buffered(1))

    out = pl.pallas_call(
        kernel,
        out_shape=jax.ShapeDtypeStruct((Bp, D), tokens.dtype),
        grid=(Bp // b_tile, Np // n_tile),
        in_specs=[
            pl.BlockSpec((b_tile, n_tile, D), lambda b, n: (b, n, 0)),  # patch tokens
            wspec((D, D)),       # Wv^T
            wspec((D, H)),       # Ws (K projection folded into CLS query)
            wspec((1, D)),       # bv
            wspec((1, H)),       # bs
            wspec((1, H)),       # s_cls  (CLS key scores)
            wspec((1, D)),       # v_cls  (CLS value row)
            wspec((H, D)),       # head -> lane expansion (0/1)
            wspec((D, D)),       # Wo^T
            wspec((1, D)),       # bo
        ],
        out_specs=pl.BlockSpec((b_tile, D), lambda b, n: (b, 0)),
        scratch_shapes=[
            pltpu.VMEM((b_tile, H), jnp.float32),   # running max
            pltpu.VMEM((b_tile, H), jnp.float32),   # running denominator
            pltpu.VMEM((b_tile, D), jnp.float32),   # running numerator
        ],
        compiler_params=pltpu.CompilerParams(
            dimension_semantics=("parallel", "arbitrary"),
            vmem_limit_bytes=vmem_limit),
    )(x, wv_t, ws_c, bv_r, bs, s_cls, v_cls, expand, wot, bo)

    return out[:B]                                                     # == out.squeeze(1)


# ---------------------------------------------------------------------------
# Pure-JAX reference (torch.nn.MultiheadAttention forward, batch_first)
# ---------------------------------------------------------------------------
def reference_attention_pool(tokens, cls_token, in_proj_w, in_proj_b,
                             out_proj_w, out_proj_b, num_heads):
    B, N, D = tokens.shape
    hd = D // num_heads
    x = jnp.concatenate([jnp.broadcast_to(cls_token, (B, 1, D)), tokens], axis=1)
    S = N + 1
    wq, wk, wv = in_proj_w[:D], in_proj_w[D:2 * D], in_proj_w[2 * D:]
    bq, bk, bv = in_proj_b[:D], in_proj_b[D:2 * D], in_proj_b[2 * D:]
    q = x[:, :1] @ wq.T + bq
    k = x @ wk.T + bk
    v = x @ wv.T + bv
    qh = q.reshape(B, 1, num_heads, hd).transpose(0, 2, 1, 3)
    kh = k.reshape(B, S, num_heads, hd).transpose(0, 2, 1, 3)
    vh = v.reshape(B, S, num_heads, hd).transpose(0, 2, 1, 3)
    scores = jnp.einsum('bhqd,bhkd->bhqk', qh, kh) / math.sqrt(hd)
    p = jax.nn.softmax(scores, axis=-1)
    o = jnp.einsum('bhqk,bhkd->bhqd', p, vh).transpose(0, 2, 1, 3).reshape(B, 1, D)
    return (o @ out_proj_w.T + out_proj_b)[:, 0]


if __name__ == "__main__":
    B, N, D, H = 2, 8, 32, 4      # batch, patch tokens, token_dim, num_heads

    key = jax.random.PRNGKey(0)
    k_tok, k_cls, k_w, k_b, k_wo, k_bo = jax.random.split(key, 6)

    tokens = jax.random.normal(k_tok, (B, N, D), dtype=jnp.float32)
    cls_token = jax.random.normal(k_cls, (1, 1, D), dtype=jnp.float32)
    in_proj_w = jax.random.normal(k_w, (3 * D, D), dtype=jnp.float32) * (1.0 / math.sqrt(D))
    in_proj_b = jax.random.normal(k_b, (3 * D,), dtype=jnp.float32) * 0.02
    out_proj_w = jax.random.normal(k_wo, (D, D), dtype=jnp.float32) * (1.0 / math.sqrt(D))
    out_proj_b = jax.random.normal(k_bo, (D,), dtype=jnp.float32) * 0.02

    ref = reference_attention_pool(tokens, cls_token, in_proj_w, in_proj_b,
                                   out_proj_w, out_proj_b, num_heads=H)

    # 1) f32 compute path: tight numerical check of the kernel math.
    out_f32 = attention_pool(tokens, cls_token, in_proj_w, in_proj_b,
                             out_proj_w, out_proj_b, num_heads=H,
                             compute_dtype=jnp.float32)
    out_f32 = jax.block_until_ready(out_f32)
    assert out_f32.shape == (B, D)
    assert jnp.allclose(out_f32, ref, atol=5e-3, rtol=5e-3), "f32 path mismatch vs reference"

    # 2) Production default (bf16 MXU operands): looser tolerance covers bf16
    #    rounding of inputs/weights; folding stays f32 so this is a sanity check.
    out_bf16 = attention_pool(tokens, cls_token, in_proj_w, in_proj_b,
                              out_proj_w, out_proj_b, num_heads=H)
    out_bf16 = jax.block_until_ready(out_bf16)
    assert out_bf16.shape == (B, D)
    assert jnp.allclose(out_bf16, ref, atol=5e-2, rtol=5e-2), "bf16 path mismatch vs reference"

    print("KERNEL_OK")
</pallas_src>

<mosaic_0001>
module attributes {stable_mosaic.version = 11 : i64} {
  func.func @kernel(%arg0: i32, %arg1: i32, %arg2: memref<8x8x32xf32, #tpu.memory_space<vmem>>, %arg3: memref<32x32xf32, #tpu.memory_space<vmem>>, %arg4: memref<32x4xf32, #tpu.memory_space<vmem>>, %arg5: memref<1x32xf32, #tpu.memory_space<vmem>>, %arg6: memref<1x4xf32, #tpu.memory_space<vmem>>, %arg7: memref<1x4xf32, #tpu.memory_space<vmem>>, %arg8: memref<1x32xf32, #tpu.memory_space<vmem>>, %arg9: memref<4x32xf32, #tpu.memory_space<vmem>>, %arg10: memref<32x32xf32, #tpu.memory_space<vmem>>, %arg11: memref<1x32xf32, #tpu.memory_space<vmem>>, %arg12: memref<8x32xf32, #tpu.memory_space<vmem>>, %arg13: memref<8x4xf32, #tpu.memory_space<vmem>>, %arg14: memref<8x4xf32, #tpu.memory_space<vmem>>, %arg15: memref<8x32xf32, #tpu.memory_space<vmem>>) attributes {dimension_semantics = [#tpu.dimension_semantics<parallel>, #tpu.dimension_semantics<arbitrary>], iteration_bounds = array<i64: 1, 1>, scalar_prefetch = 0 : i64, scratch_operands = 3 : i64, tpu.core_type = #tpu.core_type<tc>, window_params = [{transform_indices = @transform_0, window_bounds = array<i64: 8, 8, 32>}, {pipeline_mode = #tpu.pipeline_mode<synchronous>, transform_indices = @transform_1, window_bounds = array<i64: 32, 32>}, {pipeline_mode = #tpu.pipeline_mode<synchronous>, transform_indices = @transform_2, window_bounds = array<i64: 32, 4>}, {pipeline_mode = #tpu.pipeline_mode<synchronous>, transform_indices = @transform_3, window_bounds = array<i64: 1, 32>}, {pipeline_mode = #tpu.pipeline_mode<synchronous>, transform_indices = @transform_4, window_bounds = array<i64: 1, 4>}, {pipeline_mode = #tpu.pipeline_mode<synchronous>, transform_indices = @transform_5, window_bounds = array<i64: 1, 4>}, {pipeline_mode = #tpu.pipeline_mode<synchronous>, transform_indices = @transform_6, window_bounds = array<i64: 1, 32>}, {pipeline_mode = #tpu.pipeline_mode<synchronous>, transform_indices = @transform_7, window_bounds = array<i64: 4, 32>}, {pipeline_mode = #tpu.pipeline_mode<synchronous>, transform_indices = @transform_8, window_bounds = array<i64: 32, 32>}, {pipeline_mode = #tpu.pipeline_mode<synchronous>, transform_indices = @transform_9, window_bounds = array<i64: 1, 32>}, {transform_indices = @transform_10, window_bounds = array<i64: 8, 32>}]} {
    %c0_i32 = arith.constant 0 : i32
    %0 = arith.cmpi eq, %arg1, %c0_i32 : i32
    %1 = arith.extui %0 : i1 to i32
    %c0_i32_0 = arith.constant 0 : i32
    %2 = arith.cmpi ne, %1, %c0_i32_0 : i32
    scf.if %2 {
      %c0_33 = arith.constant 0 : index
      %c0_34 = arith.constant 0 : index
      %45 = vector.load %arg7[%c0_33, %c0_34] : memref<1x4xf32, #tpu.memory_space<vmem>>, vector<1x4xf32>
      %46 = vector.shape_cast %45 : vector<1x4xf32> to vector<1x4xf32>
      %47 = vector.broadcast %46 : vector<1x4xf32> to vector<8x4xf32>
      %c0_35 = arith.constant 0 : index
      %c0_36 = arith.constant 0 : index
      %48 = vector.load %arg13[%c0_35, %c0_36] : memref<8x4xf32, #tpu.memory_space<vmem>>, vector<8x4xf32>
      tpu.vector_store %arg13[%c0_35, %c0_36], %47 {strides = array<i32>} : memref<8x4xf32, #tpu.memory_space<vmem>>, vector<8x4xf32>,
      %cst_37 = arith.constant 1.000000e+00 : f32
      %49 = vector.broadcast %cst_37 : f32 to vector<8x4xf32>
      %c0_38 = arith.constant 0 : index
      %c0_39 = arith.constant 0 : index
      %50 = vector.load %arg14[%c0_38, %c0_39] : memref<8x4xf32, #tpu.memory_space<vmem>>, vector<8x4xf32>
      tpu.vector_store %arg14[%c0_38, %c0_39], %49 {strides = array<i32>} : memref<8x4xf32, #tpu.memory_space<vmem>>, vector<8x4xf32>,
      %c0_40 = arith.constant 0 : index
      %c0_41 = arith.constant 0 : index
      %51 = vector.load %arg8[%c0_40, %c0_41] : memref<1x32xf32, #tpu.memory_space<vmem>>, vector<1x32xf32>
      %52 = vector.shape_cast %51 : vector<1x32xf32> to vector<1x32xf32>
      %53 = vector.broadcast %52 : vector<1x32xf32> to vector<8x32xf32>
      %c0_42 = arith.constant 0 : index
      %c0_43 = arith.constant 0 : index
      %54 = vector.load %arg15[%c0_42, %c0_43] : memref<8x32xf32, #tpu.memory_space<vmem>>, vector<8x32xf32>
      tpu.vector_store %arg15[%c0_42, %c0_43], %53 {strides = array<i32>} : memref<8x32xf32, #tpu.memory_space<vmem>>, vector<8x32xf32>,
    } else {
    }
    %c0 = arith.constant 0 : index
    %c0_1 = arith.constant 0 : index
    %c0_2 = arith.constant 0 : index
    %3 = vector.load %arg2[%c0, %c0_1, %c0_2] : memref<8x8x32xf32, #tpu.memory_space<vmem>>, vector<8x8x32xf32>
    %4 = vector.shape_cast %3 : vector<8x8x32xf32> to vector<64x32xf32>
    %c0_3 = arith.constant 0 : index
    %c0_4 = arith.constant 0 : index
    %5 = vector.load %arg3[%c0_3, %c0_4] : memref<32x32xf32, #tpu.memory_space<vmem>>, vector<32x32xf32>
    %cst = arith.constant dense<0.000000e+00> : vector<64x32xf32>
    %6 = tpu.matmul %4, %5, %cst {dimension_numbers = #tpu.dot_dimension_numbers<[1], [0], [0], [1], [0, 0, 1, 1], [], []>} : vector<64x32xf32>, vector<32x32xf32>, vector<64x32xf32> -> vector<64x32xf32>
    %c0_5 = arith.constant 0 : index
    %c0_6 = arith.constant 0 : index
    %7 = vector.load %arg5[%c0_5, %c0_6] : memref<1x32xf32, #tpu.memory_space<vmem>>, vector<1x32xf32>
    %8 = vector.broadcast %7 : vector<1x32xf32> to vector<64x32xf32>
    %9 = arith.addf %6, %8 : vector<64x32xf32>
    %c0_7 = arith.constant 0 : index
    %c0_8 = arith.constant 0 : index
    %10 = vector.load %arg4[%c0_7, %c0_8] : memref<32x4xf32, #tpu.memory_space<vmem>>, vector<32x4xf32>
    %cst_9 = arith.constant dense<0.000000e+00> : vector<64x4xf32>
    %11 = tpu.matmul %4, %10, %cst_9 {dimension_numbers = #tpu.dot_dimension_numbers<[1], [0], [0], [1], [0, 0, 1, 1], [], []>} : vector<64x32xf32>, vector<32x4xf32>, vector<64x4xf32> -> vector<64x4xf32>
    %c0_10 = arith.constant 0 : index
    %c0_11 = arith.constant 0 : index
    %12 = vector.load %arg6[%c0_10, %c0_11] : memref<1x4xf32, #tpu.memory_space<vmem>>, vector<1x4xf32>
    %13 = vector.broadcast %12 : vector<1x4xf32> to vector<64x4xf32>
    %14 = arith.addf %11, %13 : vector<64x4xf32>
    %15 = vector.shape_cast %14 : vector<64x4xf32> to vector<8x8x4xf32>
    %c0_12 = arith.constant 0 : index
    %c0_13 = arith.constant 0 : index
    %16 = vector.load %arg13[%c0_12, %c0_13] : memref<8x4xf32, #tpu.memory_space<vmem>>, vector<8x4xf32>
    %cst_14 = arith.constant dense<0xFF800000> : vector<8x4xf32>
    %17 = vector.multi_reduction <maximumf>, %15, %cst_14 [1] : vector<8x8x4xf32> to vector<8x4xf32>
    %18 = arith.maximumf %16, %17 : vector<8x4xf32>
    %19 = arith.subf %16, %18 : vector<8x4xf32>
    %20 = math.exp %19 : vector<8x4xf32>
    %21 = vector.shape_cast %18 : vector<8x4xf32> to vector<8x1x4xf32>
    %22 = vector.broadcast %21 : vector<8x1x4xf32> to vector<8x8x4xf32>
    %23 = arith.subf %15, %22 : vector<8x8x4xf32>
    %24 = math.exp %23 : vector<8x8x4xf32>
    %c0_15 = arith.constant 0 : index
    %c0_16 = arith.constant 0 : index
    %25 = vector.load %arg14[%c0_15, %c0_16] : memref<8x4xf32, #tpu.memory_space<vmem>>, vector<8x4xf32>
    %26 = arith.mulf %20, %25 : vector<8x4xf32>
    %cst_17 = arith.constant dense<0.000000e+00> : vector<8x4xf32>
    %27 = vector.multi_reduction <add>, %24, %cst_17 [1] : vector<8x8x4xf32> to vector<8x4xf32>
    %28 = arith.addf %26, %27 : vector<8x4xf32>
    %c0_18 = arith.constant 0 : index
    %c0_19 = arith.constant 0 : index
    %29 = vector.load %arg14[%c0_18, %c0_19] : memref<8x4xf32, #tpu.memory_space<vmem>>, vector<8x4xf32>
    tpu.vector_store %arg14[%c0_18, %c0_19], %28 {strides = array<i32>} : memref<8x4xf32, #tpu.memory_space<vmem>>, vector<8x4xf32>,
    %c0_20 = arith.constant 0 : index
    %c0_21 = arith.constant 0 : index
    %30 = vector.load %arg9[%c0_20, %c0_21] : memref<4x32xf32, #tpu.memory_space<vmem>>, vector<4x32xf32>
    %31 = vector.shape_cast %24 : vector<8x8x4xf32> to vector<64x4xf32>
    %cst_22 = arith.constant dense<0.000000e+00> : vector<64x32xf32>
    %32 = tpu.matmul %31, %30, %cst_22 {dimension_numbers = #tpu.dot_dimension_numbers<[1], [0], [0], [1], [0, 0, 1, 1], [], []>} : vector<64x4xf32>, vector<4x32xf32>, vector<64x32xf32> -> vector<64x32xf32>
    %cst_23 = arith.constant dense<0.000000e+00> : vector<8x32xf32>
    %33 = tpu.matmul %20, %30, %cst_23 {dimension_numbers = #tpu.dot_dimension_numbers<[1], [0], [0], [1], [0, 0, 1, 1], [], []>} : vector<8x4xf32>, vector<4x32xf32>, vector<8x32xf32> -> vector<8x32xf32>
    %c0_24 = arith.constant 0 : index
    %c0_25 = arith.constant 0 : index
    %34 = vector.load %arg15[%c0_24, %c0_25] : memref<8x32xf32, #tpu.memory_space<vmem>>, vector<8x32xf32>
    %35 = arith.mulf %33, %34 : vector<8x32xf32>
    %36 = arith.mulf %32, %9 : vector<64x32xf32>
    %37 = vector.shape_cast %36 : vector<64x32xf32> to vector<8x8x32xf32>
    %cst_26 = arith.constant dense<0.000000e+00> : vector<8x32xf32>
    %38 = vector.multi_reduction <add>, %37, %cst_26 [1] : vector<8x8x32xf32> to vector<8x32xf32>
    %39 = arith.addf %35, %38 : vector<8x32xf32>
    %c0_27 = arith.constant 0 : index
    %c0_28 = arith.constant 0 : index
    %40 = vector.load %arg15[%c0_27, %c0_28] : memref<8x32xf32, #tpu.memory_space<vmem>>, vector<8x32xf32>
    tpu.vector_store %arg15[%c0_27, %c0_28], %39 {strides = array<i32>} : memref<8x32xf32, #tpu.memory_space<vmem>>, vector<8x32xf32>,
    %c0_29 = arith.constant 0 : index
    %c0_30 = arith.constant 0 : index
    %41 = vector.load %arg13[%c0_29, %c0_30] : memref<8x4xf32, #tpu.memory_space<vmem>>, vector<8x4xf32>
    tpu.vector_store %arg13[%c0_29, %c0_30], %18 {strides = array<i32>} : memref<8x4xf32, #tpu.memory_space<vmem>>, vector<8x4xf32>,
    %c0_i32_31 = arith.constant 0 : i32
    %42 = arith.cmpi eq, %arg1, %c0_i32_31 : i32
    %43 = arith.extui %42 : i1 to i32
    %c0_i32_32 = arith.constant 0 : i32
    %44 = arith.cmpi ne, %43, %c0_i32_32 : i32
    scf.if %44 {
      %c0_33 = arith.constant 0 : index
      %c0_34 = arith.constant 0 : index
      %45 = vector.load %arg14[%c0_33, %c0_34] : memref<8x4xf32, #tpu.memory_space<vmem>>, vector<8x4xf32>
      %cst_35 = arith.constant dense<0.000000e+00> : vector<8x32xf32>
      %46 = tpu.matmul %45, %30, %cst_35 {dimension_numbers = #tpu.dot_dimension_numbers<[1], [0], [0], [1], [0, 0, 1, 1], [], []>} : vector<8x4xf32>, vector<4x32xf32>, vector<8x32xf32> -> vector<8x32xf32>
      %47 = tpu.reciprocal %46 {approx = true} : vector<8x32xf32> -> vector<8x32xf32>
      %c0_36 = arith.constant 0 : index
      %c0_37 = arith.constant 0 : index
      %48 = vector.load %arg15[%c0_36, %c0_37] : memref<8x32xf32, #tpu.memory_space<vmem>>, vector<8x32xf32>
      %49 = arith.mulf %48, %47 : vector<8x32xf32>
      %c0_38 = arith.constant 0 : index
      %c0_39 = arith.constant 0 : index
      %50 = vector.load %arg10[%c0_38, %c0_39] : memref<32x32xf32, #tpu.memory_space<vmem>>, vector<32x32xf32>
      %cst_40 = arith.constant dense<0.000000e+00> : vector<8x32xf32>
      %51 = tpu.matmul %49, %50, %cst_40 {dimension_numbers = #tpu.dot_dimension_numbers<[1], [0], [0], [1], [0, 0, 1, 1], [], []>} : vector<8x32xf32>, vector<32x32xf32>, vector<8x32xf32> -> vector<8x32xf32>
      %c0_41 = arith.constant 0 : index
      %c0_42 = arith.constant 0 : index
      %52 = vector.load %arg11[%c0_41, %c0_42] : memref<1x32xf32, #tpu.memory_space<vmem>>, vector<1x32xf32>
      %53 = vector.broadcast %52 : vector<1x32xf32> to vector<8x32xf32>
      %54 = arith.addf %51, %53 : vector<8x32xf32>
      %c0_43 = arith.constant 0 : index
      %c0_44 = arith.constant 0 : index
      %55 = vector.load %arg12[%c0_43, %c0_44] : memref<8x32xf32, #tpu.memory_space<vmem>>, vector<8x32xf32>
      tpu.vector_store %arg12[%c0_43, %c0_44], %54 {strides = array<i32>} : memref<8x32xf32, #tpu.memory_space<vmem>>, vector<8x32xf32>,
    } else {
    }
    return
  }
  func.func @transform_0(%arg0: i32, %arg1: i32) -> (i32, i32, i32) {
    %c0_i32 = arith.constant 0 : i32
    %c0_i32_0 = arith.constant 0 : i32
    return %arg0, %arg1, %c0_i32 : i32, i32, i32
  }
  func.func @transform_1(%arg0: i32, %arg1: i32) -> (i32, i32) {
    %c0_i32 = arith.constant 0 : i32
    %c0_i32_0 = arith.constant 0 : i32
    %c0_i32_1 = arith.constant 0 : i32
    return %c0_i32, %c0_i32_0 : i32, i32
  }
  func.func @transform_2(%arg0: i32, %arg1: i32) -> (i32, i32) {
    %c0_i32 = arith.constant 0 : i32
    %c0_i32_0 = arith.constant 0 : i32
    %c0_i32_1 = arith.constant 0 : i32
    return %c0_i32, %c0_i32_0 : i32, i32
  }
  func.func @transform_3(%arg0: i32, %arg1: i32) -> (i32, i32) {
    %c0_i32 = arith.constant 0 : i32
    %c0_i32_0 = arith.constant 0 : i32
    %c0_i32_1 = arith.constant 0 : i32
    return %c0_i32, %c0_i32_0 : i32, i32
  }
  func.func @transform_4(%arg0: i32, %arg1: i32) -> (i32, i32) {
    %c0_i32 = arith.constant 0 : i32
    %c0_i32_0 = arith.constant 0 : i32
    %c0_i32_1 = arith.constant 0 : i32
    return %c0_i32, %c0_i32_0 : i32, i32
  }
  func.func @transform_5(%arg0: i32, %arg1: i32) -> (i32, i32) {
    %c0_i32 = arith.constant 0 : i32
    %c0_i32_0 = arith.constant 0 : i32
    %c0_i32_1 = arith.constant 0 : i32
    return %c0_i32, %c0_i32_0 : i32, i32
  }
  func.func @transform_6(%arg0: i32, %arg1: i32) -> (i32, i32) {
    %c0_i32 = arith.constant 0 : i32
    %c0_i32_0 = arith.constant 0 : i32
    %c0_i32_1 = arith.constant 0 : i32
    return %c0_i32, %c0_i32_0 : i32, i32
  }
  func.func @transform_7(%arg0: i32, %arg1: i32) -> (i32, i32) {
    %c0_i32 = arith.constant 0 : i32
    %c0_i32_0 = arith.constant 0 : i32
    %c0_i32_1 = arith.constant 0 : i32
    return %c0_i32, %c0_i32_0 : i32, i32
  }
  func.func @transform_8(%arg0: i32, %arg1: i32) -> (i32, i32) {
    %c0_i32 = arith.constant 0 : i32
    %c0_i32_0 = arith.constant 0 : i32
    %c0_i32_1 = arith.constant 0 : i32
    return %c0_i32, %c0_i32_0 : i32, i32
  }
  func.func @transform_9(%arg0: i32, %arg1: i32) -> (i32, i32) {
    %c0_i32 = arith.constant 0 : i32
    %c0_i32_0 = arith.constant 0 : i32
    %c0_i32_1 = arith.constant 0 : i32
    return %c0_i32, %c0_i32_0 : i32, i32
  }
  func.func @transform_10(%arg0: i32, %arg1: i32) -> (i32, i32) {
    %c0_i32 = arith.constant 0 : i32
    %c0_i32_0 = arith.constant 0 : i32
    return %arg0, %c0_i32 : i32, i32
  }
}

</mosaic_0001>

<bundles_post_ra>
// kernel: tpu_custom_call.1
= control target key start
LH: loop header
LB: loop body
LE: loop exit
PB: predicated region body
PF: predicated region fallthrough
CT: control target
= control target key end

     0   :  { %15 = vsyncpa [#allocation6], 0  ;;  %s1761_s0 = inlined_call_operand.hbm [shape: f32[8,8,32], index: 0, kind: input, shape index: {}]   ;;  %s1762_s1 = inlined_call_operand.vmem [shape: f32[32,32], index: 1, kind: input, shape index: {}]   ;;  %s1763_s2 = inlined_call_operand.vmem [shape: f32[32,4], index: 2, kind: input, shape index: {}]   ;;  %s1764_s3 = inlined_call_operand.vmem [shape: f32[1,32], index: 3, kind: input, shape index: {}]   ;;  %s1765_s4 = inlined_call_operand.vmem [shape: f32[1,4], index: 4, kind: input, shape index: {}]   ;;  %s1766_s5 = inlined_call_operand.hbm [shape: f32[1,4], index: 5, kind: input, shape index: {}]   ;;  %s1767_s6 = inlined_call_operand.hbm [shape: f32[1,32], index: 6, kind: input, shape index: {}]   ;;  %s1768_s7 = inlined_call_operand.hbm [shape: f32[4,32], index: 7, kind: input, shape index: {}]   ;;  %s1769_s8 = inlined_call_operand.vmem [shape: f32[32,32], index: 8, kind: input, shape index: {}]   ;;  %s1770_s9 = inlined_call_operand.vmem [shape: f32[1,32], index: 9, kind: input, shape index: {}]   ;;  %s1771_s10 = inlined_call_operand.hbm [shape: f32[8,32], index: 10, kind: output, shape index: {}]  }
   0x1   :  { %16 = vsyncpa [#allocation9], 0 }
   0x2   :  { %17 = vsyncpa [#allocation12], 0 }
   0x3   :  { %18 = vsyncpa [#allocation7], 0  ;;  %s1446_s13 = smov [#allocation8]   ;;  %s1447_s15 = smov [#allocation5]  }
   0x4   :  { %s45_s14 = sshll.u32 %s1446_s13, 4  ;;  %s24_s16 = sshll.u32 %s1447_s15, 4  ;;  %s46_s14 = int_to_ptr.vmem [resolvable:$true] %s45_s14  ;;  %s1513_s16 = int_to_ptr.vmem [resolvable:$true] %s24_s16 }
   0x5   :  { %s1328_s19 = scalar_lea.hbm %s1766_s5, 16 }
   0x6   :  { %p1329_p0 = scmp.ne.s32.totalorder %s1766_s5, %s1328_s19  ;;  %p1332_p1 = scmp.lt.u32.totalorder %s1328_s19, %s1766_s5 }
   0x8   :  { %p1334_p2 = pnand %p1332_p1, %p1329_p0 }
   0xa   :  { %1337 = shalt.err (!%p1334_p2)
}
   0xb   :  { %s1338_s24 = scalar_lea.vmem %s46_s14, 16  ;;  %s1342_s25 = scalar_lea.vmem %s46_s14, 32 }
   0xc   :  { %p1339_p3 = scmp.ne.s32.totalorder %s46_s14, %s1338_s24  ;;  %p1343_p4 = scmp.lt.s32.totalorder %s46_s14, %s46_s14 }
   0xd   :  { %p1344_p5 = scmp.lt.s32.totalorder %s1342_s25, %s1338_s24 }
   0xf   :  { %p1345_p6 = por %p1344_p5, %p1343_p4 }
  0x11   :  { %p1346_p7 = pnand %p1345_p6, %p1339_p3 }
  0x13   :  { %1349 = shalt.err (!%p1346_p7)
}
  0x14   :  { %48 = dma.hbm_to_vmem [thread:$0]  %s1766_s5, 16, %s46_s14, [#allocation9]  }
  0x15   :  { %s1350_s30 = scalar_lea.hbm %s1761_s0, 1024 }
  0x16   :  { %p1351_p8 = scmp.ne.s32.totalorder %s1761_s0, %s1350_s30  ;;  %p1354_p9 = scmp.lt.u32.totalorder %s1350_s30, %s1761_s0 }
  0x18   :  { %p1356_p10 = pnand %p1354_p9, %p1351_p8 }
  0x1a   :  { %1359 = shalt.err (!%p1356_p10)
}
  0x1b   :  { %s1360_s17 = scalar_lea.vmem %s1513_s16, 1024  ;;  %p1365_p12 = scmp.lt.s32.totalorder %s1513_s16, %s1513_s16 }
  0x1c   :  { %p1361_p11 = scmp.ne.s32.totalorder %s1513_s16, %s1360_s17  ;;  %p1366_p13 = scmp.lt.s32.totalorder %s1360_s17, %s1360_s17 }
  0x1e   :  { %p1367_p0 = por %p1366_p13, %p1365_p12 }
  0x20   :  { %p1368_p1 = pnand %p1367_p0, %p1361_p11 }
  0x22   :  { %1371 = shalt.err (!%p1368_p1)
}
  0x23   :  { %s1448_s5 = smov 128   ;;  %s1449_s14 = smov 8  }
  0x24   :  { %30 = dma.hbm_to_vmem [thread:$0]  %s1761_s0, 1024, %s1513_s16, [#allocation6], %s1448_s5, %s1448_s5, %s1449_s14  }
  0x25   :  { %s1450_s20 = smov [#allocation10]   ;;  %s1451_s22 = smov [#allocation11]  }
  0x26   :  { %s55_s21 = sshll.u32 %s1450_s20, 4  ;;  %s65_s23 = sshll.u32 %s1451_s22, 4  ;;  %s56_s21 = int_to_ptr.vmem [resolvable:$true] %s55_s21  ;;  %s66_s23 = int_to_ptr.vmem [resolvable:$true] %s65_s23 }
  0x27   :  { %s1372_s26 = scalar_lea.hbm %s1767_s6, 16 }
  0x28   :  { %p1373_p2 = scmp.ne.s32.totalorder %s1767_s6, %s1372_s26  ;;  %p1376_p3 = scmp.lt.u32.totalorder %s1372_s26, %s1767_s6 }
  0x2a   :  { %p1378_p4 = pnand %p1376_p3, %p1373_p2 }
  0x2c   :  { %1381 = shalt.err (!%p1378_p4)
}
  0x2d   :  { %s1382_s0 = scalar_lea.vmem %s56_s21, 16  ;;  %s1386_s16 = scalar_lea.vmem %s56_s21, 32 }
  0x2e   :  { %p1383_p5 = scmp.ne.s32.totalorder %s56_s21, %s1382_s0  ;;  %p1387_p6 = scmp.lt.s32.totalorder %s56_s21, %s56_s21 }
  0x2f   :  { %p1388_p7 = scmp.lt.s32.totalorder %s1386_s16, %s1382_s0 }
  0x31   :  { %p1389_p8 = por %p1388_p7, %p1387_p6 }
  0x33   :  { %p1390_p9 = pnand %p1389_p8, %p1383_p5 }
  0x35   :  { %1393 = shalt.err (!%p1390_p9)
}
  0x36   :  { %58 = dma.hbm_to_vmem [thread:$0]  %s1767_s6, 16, %s56_s21, [#allocation9]  }
  0x37   :  { %s1394_s17 = scalar_lea.hbm %s1768_s7, 64 }
  0x38   :  { %p1395_p10 = scmp.ne.s32.totalorder %s1768_s7, %s1394_s17  ;;  %p1398_p11 = scmp.lt.u32.totalorder %s1394_s17, %s1768_s7 }
  0x3a   :  { %p1400_p12 = pnand %p1398_p11, %p1395_p10 }
  0x3c   :  { %1403 = shalt.err (!%p1400_p12)
}
  0x3d   :  { %s1404_s20 = scalar_lea.vmem %s66_s23, 64  ;;  %p1409_p0 = scmp.lt.s32.totalorder %s66_s23, %s66_s23 }
  0x3e   :  { %p1405_p13 = scmp.ne.s32.totalorder %s66_s23, %s1404_s20  ;;  %p1410_p1 = scmp.lt.s32.totalorder %s1404_s20, %s1404_s20 }
  0x40   :  { %p1411_p2 = por %p1410_p1, %p1409_p0 }
  0x42   :  { %p1412_p3 = pnand %p1411_p2, %p1405_p13 }
  0x44   :  { %1415 = shalt.err (!%p1412_p3)
}
  0x45   :  { %68 = dma.hbm_to_vmem [thread:$0]  %s1768_s7, 64, %s66_s23, [#allocation12]  }
  0x46   :  { %1438 = dma.done.wait [#allocation6], 1024  }
  0x47   :  { %1439 = vsyncadd [#allocation6], 4294966272 }
  0x48   :  { %1440 = dma.done.wait [#allocation9], 32  }
  0x49   :  { %1441 = vsyncadd [#allocation9], 4294967264 }
  0x4a   :  { %1442 = dma.done.wait [#allocation12], 64  }
  0x4b   :  { %1443 = vsyncadd [#allocation12], 4294967232  ;;  %vm106_vm0 = vcmask 261120   ;;  %v257_v0 = vld [vmem:[%s1763_s2] sm:$0xff]  ;;  %v258_v1 = vld [vmem:[%s1763_s2 + $0x8] sm:$0xff]  ;;  %vm96_vm1 = vcmask 31744  }
  0x4c   :  { %v259_v2 = vld [vmem:[%s1763_s2 + $0x10] sm:$0xff]  ;;  %v1282_v3 = vpack.c.bf16 %v258_v1, %v257_v0  ;;  %v260_v4 = vld [vmem:[%s1763_s2 + $0x18] sm:$0xff]  ;;  %v109_v7 = vld [vmem:[#allocation5 + $0x8] sm:$0xff]  ;;  %v1452_v15 = vmov 1.0   ;;  %vm673_vm2 = vcmask 1043456   ;;  %v1453_v23 = vmov 0.0  }
  0x4d   :  { %v108_v5 = vld [vmem:[#allocation5] sm:$0xff]  ;;  %v1286_v6 = vpack.c.bf16 %v260_v4, %v259_v2  ;;  %v110_v8 = vld [vmem:[#allocation5 + $0x10] sm:$0xff]  ;;  %v111_v9 = vld [vmem:[#allocation5 + $0x18] sm:$0xff]  ;;  %98 = vst.msk [vmem:[#allocation3] sm:$0xff] %vm96_vm1, %v1452_v15  ;;  %vm1454_vm3 = vmmov 0   ;;  %vm439_vm4 = vcmask 1041409  }
  0x4e   :  { %1227 = vmatprep.mubr.msk.f32.mxu1 %vm106_vm0, %v108_v5  ;;  %1207 = vmatprep.mubr.msk.f32.mxu0 %vm106_vm0, %v108_v5  ;;  %v112_v10 = vld [vmem:[#allocation5 + $0x20] sm:$0xff]  ;;  %v113_v11 = vld [vmem:[#allocation5 + $0x28] sm:$0xff]  ;;  %v114_v12 = vld [vmem:[#allocation5 + $0x30] sm:$0xff]  ;;  %vm441_vm5 = vcmask 1042434   ;;  %vm443_vm6 = vcmask 1043459   ;;  %vm445_vm7 = vcmask 1044484  }
  0x4f   :  { %1283 = vmatprep.subr.bf16.mxu1 %v1282_v3  ;;  %v115_v13 = vld [vmem:[#allocation5 + $0x38] sm:$0xff]  ;;  %v1122_v14 = vld [vmem:[#allocation8] ss:$0 sm:$0xff]  ;;  %v116_v16 = vld [vmem:[%s1762_s1] sm:$0xff]  ;;  %vm447_vm8 = vcmask 1045509   ;;  %vm449_vm9 = vcmask 1046534  }
  0x50   :  { %1285 = vmatpush3.bf16.msra.mxu1 %v1282_v3  ;;  %97 = vst.msk [vmem:[#allocation2] sm:$0xff] %vm96_vm1, %v1122_v14  ;;  %v117_v17 = vld [vmem:[%s1762_s1 + $0x8] sm:$0xff]  ;;  %v118_v19 = vld [vmem:[%s1762_s1 + $0x10] sm:$0xff]  ;;  %v119_v20 = vld [vmem:[%s1762_s1 + $0x18] sm:$0xff]  ;;  %vm451_vm10 = vcmask 1047559   ;;  %s1457_s24 = smov [#allocation13]  }
  0x51   :  { %1287 = vmatprep.subr.bf16.mxu1 %v1286_v6  ;;  %v1274_v18 = vpack.c.bf16 %v117_v17, %v116_v16  ;;  %v1278_v21 = vpack.c.bf16 %v119_v20, %v118_v19  ;;  %v1607_v22 = vld [vmem:[#allocation11] sm:$0xf]  ;;  %v1133_v24 = vld [vmem:[%s1765_s4] ss:$0 sm:$0xff]  ;;  %v1123_v54 = vld [vmem:[#allocation10] ss:$0 sm:$0xff] }
  0x52   :  { %107 = vst.msk [vmem:[#allocation4] sm:$0xff] %vm106_vm0, %v1123_v54  ;;  %s1111_s25 = sshll.u32 %s1457_s24, 4  ;;  %s1112_s25 = int_to_ptr.vmem [resolvable:$true] %s1111_s25 }
  0x53   :  { %1275 = vmatprep.subr.bf16.mxu0 %v1274_v18  ;;  %s1416_s26 = scalar_lea.vmem %s1112_s25, 128  ;;  %p1421_p5 = scmp.lt.s32.totalorder %s1112_s25, %s1112_s25 }
  0x54   :  { %1289 = vmatpush3.bf16.msra.mxu1 %v1286_v6  ;;  %1277 = vmatpush3.bf16.msra.mxu0 %v1274_v18  ;;  %p1417_p4 = scmp.ne.s32.totalorder %s1112_s25, %s1416_s26  ;;  %p1422_p6 = scmp.lt.s32.totalorder %s1416_s26, %s1416_s26 }
  0x55   :  { %1279 = vmatprep.subr.bf16.mxu0 %v1278_v21  ;;  %1253 = vmatprep.subr.mxu1 %v1453_v23 }
  0x56   :  { %p1423_p7 = por %p1422_p6, %p1421_p5 }
  0x57   :  { %1228 = vmatmul.mubr.msk.f32.vlgmr.msra.gmra.mrb[0].mxu1 %vm106_vm0, %v109_v7 }
  0x58   :  { %1230 = vmatprep.mubr.msk.f32.mxu1 %vm106_vm0, %v110_v8  ;;  %1281 = vmatpush3.bf16.msra.mxu0 %v1278_v21  ;;  %p1424_p8 = pnand %p1423_p7, %p1417_p4 }
  0x59   :  { %1239 = vmatprep.subr.msk.mxu0 %vm673_vm2, %v1607_v22  ;;  %1254 = vmatpush3.msk.msra.mxu1 %vm673_vm2, %v1607_v22 }
  0x5a   :  { %1258 = vmatprep.subr.mxu1 %v1453_v23 }
  0x5b   :  { %1231 = vmatmul.mubr.msk.f32.gmra.mrb[2].mxu1 %vm106_vm0, %v111_v9  ;;  %1208 = vmatmul.mubr.msk.f32.vlgmr.msra.gmra.mrb[0].mxu0 %vm106_vm0, %v109_v7 }
  0x5c   :  { %1233 = vmatprep.mubr.msk.f32.mxu1 %vm106_vm0, %v112_v10  ;;  %1210 = vmatprep.mubr.msk.f32.mxu0 %vm106_vm0, %v110_v8 }
  0x5d   :  { %1240 = vmatpush3.msk.msra.mxu0 %vm673_vm2, %v1607_v22 }
  0x5f   :  { %1234 = vmatmul.mubr.msk.f32.gmra.mrb[4].mxu1 %vm106_vm0, %v113_v11  ;;  %1211 = vmatmul.mubr.msk.f32.gmra.mrb[2].mxu0 %vm106_vm0, %v111_v9 }
  0x60   :  { %1236 = vmatprep.mubr.msk.f32.mxu1 %vm106_vm0, %v114_v12  ;;  %1213 = vmatprep.mubr.msk.f32.mxu0 %vm106_vm0, %v112_v10 }
  0x63   :  { %1237 = vmatmul.mubr.msk.f32.gmra.mrb[6].mxu1 %vm106_vm0, %v115_v13  ;;  %1214 = vmatmul.mubr.msk.f32.gmra.mrb[4].mxu0 %vm106_vm0, %v113_v11 }
  0x64   :  { %1255 = vmatprep.mubr.msk.f32.mxu1 %vm1454_vm3, %v1453_v23  ;;  %1216 = vmatprep.mubr.msk.f32.mxu0 %vm106_vm0, %v114_v12 }
  0x67   :  { %1217 = vmatmul.mubr.msk.f32.gmra.mrb[6].mxu0 %vm106_vm0, %v115_v13 }
 0x12a   :  { %v1229_v25 = vpop.f32.mrb[0].mxu1 }
 0x12b   :  { %v1625_v26 = vadd.f32 %v1229_v25, %v1133_v24  ;;  %v334_v27 = vpop.f32.mrb[1].mxu1 }
 0x12c   :  { %v1627_v28 = vadd.f32 %v1133_v24, %v334_v27 }
 0x12d   :  { %v382_v29 = vsel %vm96_vm1, %v1625_v26, -inf }
 0x12e   :  { %v383_v30 = vrot.slane %v382_v29, 4  ;;  %v375_v31 = vsel %vm96_vm1, %v1627_v28, -inf  ;;  %v1232_v32 = vpop.f32.mrb[2].mxu1 }
 0x12f   :  { %v376_v33 = vrot.slane %v375_v31, 4  ;;  %v1633_v34 = vadd.f32 %v1232_v32, %v1133_v24  ;;  %v344_v35 = vpop.f32.mrb[3].mxu1 }
 0x130   :  { %v384_v36 = vmax.f32 %v382_v29, %v383_v30  ;;  %v1635_v37 = vadd.f32 %v1133_v24, %v344_v35  ;;  %v1455_v29 = vmov 1966171168   ;;  %v463_v35 = vlaneseq }
 0x131   :  { %v377_v38 = vmax.f32 %v375_v31, %v376_v33  ;;  %v396_v39 = vsel %vm96_vm1, %v1633_v34, -inf  ;;  %v461_v30 = vunpack.c.l.s4 %v1455_v29 }
 0x132   :  { %v385_v40 = vrot.slane %v384_v36, 2  ;;  %v397_v41 = vrot.slane %v396_v39, 4  ;;  %v389_v42 = vsel %vm96_vm1, %v1635_v37, -inf  ;;  %v1235_v43 = vpop.f32.mrb[4].mxu1 }
 0x133   :  { %v378_v44 = vrot.slane %v377_v38, 2  ;;  %v390_v45 = vrot.slane %v389_v42, 4  ;;  %v1641_v46 = vadd.f32 %v1235_v43, %v1133_v24  ;;  %v354_v47 = vpop.f32.mrb[5].mxu1 }
 0x134   :  { %v386_v48 = vmax.f32 %v384_v36, %v385_v40  ;;  %v398_v49 = vmax.f32 %v396_v39, %v397_v41  ;;  %v1643_v50 = vadd.f32 %v1133_v24, %v354_v47  ;;  %v464_v47 = vshrl.u32 %v463_v35, 7 }
 0x135   :  { %v379_v51 = vmax.f32 %v377_v38, %v378_v44  ;;  %v391_v52 = vmax.f32 %v389_v42, %v390_v45  ;;  %v410_v53 = vsel %vm96_vm1, %v1641_v46, -inf  ;;  %v462_v45 = vunpack.c.0.s8 %v461_v30 }
 0x136   :  { %v387_v55 = vrot.slane %v386_v48, 1  ;;  %v399_v56 = vrot.slane %v398_v49, 2  ;;  %v411_v57 = vrot.slane %v410_v53, 4  ;;  %v403_v58 = vsel %vm96_vm1, %v1643_v50, -inf  ;;  %v1238_v59 = vpop.f32.mrb[6].mxu1 }
 0x137   :  { %v380_v60 = vrot.slane %v379_v51, 1  ;;  %v392_v61 = vrot.slane %v391_v52, 2  ;;  %v404_v62 = vrot.slane %v403_v58, 4  ;;  %v1650_v63 = vadd.f32 %v1238_v59, %v1133_v24  ;;  %v364_v0 = vpop.f32.mrb[7].mxu1 }
 0x138   :  { %v388_v1 = vmax.f32 %v386_v48, %v387_v55  ;;  %v400_v2 = vmax.f32 %v398_v49, %v399_v56  ;;  %v412_v3 = vmax.f32 %v410_v53, %v411_v57  ;;  %v1652_v4 = vadd.f32 %v1133_v24, %v364_v0 }
 0x139   :  { %v381_v5 = vmax.f32 %v379_v51, %v380_v60  ;;  %v393_v6 = vmax.f32 %v391_v52, %v392_v61  ;;  %v405_v7 = vmax.f32 %v403_v58, %v404_v62  ;;  %v424_v8 = vsel %vm96_vm1, %v1650_v63, -inf  ;;  %v373_v52 = vld [vmem:[#allocation2] sm:$0xff] }
 0x13a   :  { %v401_v9 = vrot.slane %v400_v2, 1  ;;  %v413_v10 = vrot.slane %v412_v3, 2  ;;  %v425_v11 = vrot.slane %v424_v8, 4  ;;  %v417_v12 = vsel %vm96_vm1, %v1652_v4, -inf }
 0x13b   :  { %v440_v13 = vsel %vm439_vm4, %v388_v1, %v381_v5  ;;  %v394_v14 = vrot.slane %v393_v6, 1  ;;  %v406_v15 = vrot.slane %v405_v7, 2  ;;  %v418_v16 = vrot.slane %v417_v12, 4 }
 0x13c   :  { %v414_v17 = vmax.f32 %v412_v3, %v413_v10  ;;  %v426_v18 = vmax.f32 %v424_v8, %v425_v11  ;;  %v402_v24 = vmax.f32 %v400_v2, %v401_v9  ;;  %v465_v54 = vsub.s32 %v462_v45, %v464_v47 }
 0x13d   :  { %v395_v19 = vmax.f32 %v393_v6, %v394_v14  ;;  %v407_v20 = vmax.f32 %v405_v7, %v406_v15  ;;  %v419_v21 = vmax.f32 %v417_v12, %v418_v16  ;;  %v510_v60 = vsub.s32 0, %v464_v47 }
 0x13e   :  { %v415_v25 = vrot.slane %v414_v17, 1  ;;  %v427_v27 = vrot.slane %v426_v18, 2 }
 0x13f   :  { %v442_v31 = vsel %vm441_vm5, %v395_v19, %v440_v13  ;;  %v408_v32 = vrot.slane %v407_v20, 1  ;;  %v420_v33 = vrot.slane %v419_v21, 2 }
 0x140   :  { %v444_v36 = vsel %vm443_vm6, %v402_v24, %v442_v31  ;;  %v428_v38 = vmax.f32 %v426_v18, %v427_v27  ;;  %v416_v41 = vmax.f32 %v414_v17, %v415_v25 }
 0x141   :  { %v409_v39 = vmax.f32 %v407_v20, %v408_v32  ;;  %v421_v40 = vmax.f32 %v419_v21, %v420_v33 }
 0x142   :  { %v429_v42 = vrot.slane %v428_v38, 1 }
 0x143   :  { %v446_v43 = vsel %vm445_vm7, %v409_v39, %v444_v36  ;;  %v422_v44 = vrot.slane %v421_v40, 1 }
 0x144   :  { %v448_v48 = vsel %vm447_vm8, %v416_v41, %v446_v43  ;;  %v430_v51 = vmax.f32 %v428_v38, %v429_v42 }
 0x145   :  { %v423_v49 = vmax.f32 %v421_v40, %v422_v44 }
 0x147   :  { %v450_v53 = vsel %vm449_vm9, %v423_v49, %v448_v48 }
 0x148   :  { %v452_v55 = vsel %vm451_vm10, %v430_v51, %v450_v53 }
 0x149   :  { %v454_v56 = vmax.f32 %v373_v52, %v452_v55 }
 0x14b   :  { %v455_v57 = vsub.f32 %v373_v52, %v454_v56  ;;  %v459_v58 = vcombine.high %v454_v56, %v454_v56  ;;  %v466_v59 = vrot.slane %v454_v56, %v465_v54  ;;  %939 = vst.msk [vmem:[#allocation2] sm:$0xff] %vm96_vm1, %v454_v56 }
 0x14d   :  { %v456_v61 = vmul.f32 1.442695, %v455_v57  ;;  %v473_v62 = vrot.slane %v459_v58, %v465_v54  ;;  %v474_v0 = vcombine.high %v466_v59, %v466_v59  ;;  %v482_v1 = vrot.slane %v466_v59, %v465_v54 }
 0x14f   :  { %1308 = vpow2.f32 %v456_v61  ;;  %v475_v2 = vcombine.high %v473_v62, %v473_v62  ;;  %v489_v3 = vrot.slane %v473_v62, %v465_v54  ;;  %v496_v5 = vrot.slane %v474_v0, %v465_v54 }
 0x150   :  { %v504_v6 = vcombine.high %v482_v1, %v482_v1  ;;  %v511_v7 = vrot.slane %v482_v1, %v510_v60 }
 0x151   :  { %v503_v8 = vrot.slane %v475_v2, %v465_v54  ;;  %v505_v9 = vcombine.high %v489_v3, %v489_v3  ;;  %v506_v10 = vcombine.high %v496_v5, %v496_v5  ;;  %v515_v11 = vrot.slane %v496_v5, %v510_v60 }
 0x152   :  { %v519_v12 = vrot.slane %v504_v6, %v510_v60  ;;  %v527_v13 = vrot.slane %v489_v3, %v510_v60  ;;  %v548_v14 = vsub.f32 %v1627_v28, %v511_v7 }
 0x153   :  { %v507_v15 = vcombine.high %v503_v8, %v503_v8  ;;  %v523_v16 = vrot.slane %v506_v10, %v510_v60  ;;  %v531_v17 = vrot.slane %v503_v8, %v510_v60  ;;  %v535_v18 = vrot.slane %v505_v9, %v510_v60 }
 0x154   :  { %v549_v19 = vsub.f32 %v1625_v26, %v515_v11  ;;  %v550_v20 = vsub.f32 %v1635_v37, %v519_v12  ;;  %v552_v21 = vsub.f32 %v1643_v50, %v527_v13  ;;  %v556_v24 = vmul.f32 1.442695, %v548_v14 }
 0x155   :  { %v539_v25 = vrot.slane %v507_v15, %v510_v60  ;;  %v551_v27 = vsub.f32 %v1633_v34, %v523_v16  ;;  %v553_v29 = vsub.f32 %v1641_v46, %v531_v17  ;;  %v554_v30 = vsub.f32 %v1652_v4, %v535_v18 }
 0x156   :  { %1310 = vpow2.f32 %v556_v24  ;;  %v558_v28 = vmul.f32 1.442695, %v549_v19  ;;  %v560_v31 = vmul.f32 1.442695, %v550_v20  ;;  %v564_v35 = vmul.f32 1.442695, %v552_v21 }
 0x157   :  { %v555_v32 = vsub.f32 %v1650_v63, %v539_v25  ;;  %v562_v33 = vmul.f32 1.442695, %v551_v27  ;;  %v566_v26 = vmul.f32 1.442695, %v553_v29  ;;  %v568_v50 = vmul.f32 1.442695, %v554_v30 }
 0x158   :  { %1312 = vpow2.f32 %v558_v28 }
 0x159   :  { %v1674_v37 = vpop.eup %1308  ;;  %1314 = vpow2.f32 %v560_v31  ;;  %v570_v36 = vmul.f32 1.442695, %v555_v32 }
 0x15a   :  { %1316 = vpow2.f32 %v562_v33  ;;  %1256 = vmatmul.mubr.msk.f32.vlgmr.msra.gmra.mrb[8].mxu1 %vm96_vm1, %v1674_v37 }
 0x15b   :  { %1318 = vpow2.f32 %v564_v35  ;;  %1259 = vmatpush3.msk.msra.mxu1 %vm673_vm2, %v1607_v22  ;;  %1260 = vmatprep.mubr.msk.f32.mxu1 %vm1454_vm3, %v1453_v23 }
 0x15c   :  { %1320 = vpow2.f32 %v566_v26 }
 0x15d   :  { %1322 = vpow2.f32 %v568_v50 }
 0x15e   :  { %1324 = vpow2.f32 %v570_v36 }
 0x160   :  { %v1311_v34 = vpop.eup %1310 }
 0x161   :  { %v574_v46 = vsel %vm96_vm1, %v1311_v34, 0.0  ;;  %1241 = vmatprep.mubr.msk.f32.mxu0 %vm96_vm1, %v1311_v34 }
 0x162   :  { %v1313_v63 = vpop.eup %1312  ;;  %v575_v4 = vrot.slane %v574_v46, 4 }
 0x163   :  { %v1315_v38 = vpop.eup %1314  ;;  %v581_v39 = vsel %vm96_vm1, %v1313_v63, 0.0  ;;  %1242 = vmatmul.mubr.msk.f32.vlgmr.msra.gmra.mrb[8].mxu0 %vm96_vm1, %v1313_v63 }
 0x164   :  { %v1317_v40 = vpop.eup %1316  ;;  %v576_v22 = vadd.f32 %v575_v4, %v574_v46  ;;  %v582_v41 = vrot.slane %v581_v39, 4  ;;  %v588_v42 = vsel %vm96_vm1, %v1315_v38, 0.0  ;;  %1244 = vmatprep.mubr.msk.f32.mxu0 %vm96_vm1, %v1315_v38  ;;  %v572_v38 = vld [vmem:[#allocation3] sm:$0xff] }
 0x165   :  { %v1319_v43 = vpop.eup %1318  ;;  %v589_v44 = vrot.slane %v588_v42, 4  ;;  %v595_v45 = vsel %vm96_vm1, %v1317_v40, 0.0 }
 0x166   :  { %v1321_v47 = vpop.eup %1320  ;;  %v577_v48 = vrot.slane %v576_v22, 2  ;;  %v583_v49 = vadd.f32 %v582_v41, %v581_v39  ;;  %v596_v51 = vrot.slane %v595_v45, 4  ;;  %v602_v52 = vsel %vm96_vm1, %v1319_v43, 0.0 }
 0x167   :  { %v1323_v53 = vpop.eup %1322  ;;  %v590_v54 = vadd.f32 %v589_v44, %v588_v42  ;;  %v603_v55 = vrot.slane %v602_v52, 4  ;;  %v609_v56 = vsel %vm96_vm1, %v1321_v47, 0.0  ;;  %1245 = vmatmul.mubr.msk.f32.gmra.mrb[10].mxu0 %vm96_vm1, %v1317_v40  ;;  %v573_v41 = vmul.f32 %v1674_v37, %v572_v38 }
 0x168   :  { %v1325_v57 = vpop.eup %1324  ;;  %v578_v58 = vadd.f32 %v577_v48, %v576_v22  ;;  %v584_v59 = vrot.slane %v583_v49, 2  ;;  %v597_v60 = vadd.f32 %v596_v51, %v595_v45  ;;  %v610_v61 = vrot.slane %v609_v56, 4  ;;  %1247 = vmatprep.mubr.msk.f32.mxu0 %vm96_vm1, %v1319_v43 }
 0x169   :  { %v591_v62 = vrot.slane %v590_v54, 2  ;;  %v604_v0 = vadd.f32 %v603_v55, %v602_v52  ;;  %v616_v1 = vsel %vm96_vm1, %v1323_v53, 0.0  ;;  %v623_v2 = vsel %vm96_vm1, %v1325_v57, 0.0  ;;  %v1020_v55 = vld [vmem:[%s1769_s8] sm:$0xff] }
 0x16a   :  { %v579_v3 = vrot.slane %v578_v58, 1  ;;  %v585_v5 = vadd.f32 %v584_v59, %v583_v49  ;;  %v598_v6 = vrot.slane %v597_v60, 2  ;;  %v611_v7 = vadd.f32 %v610_v61, %v609_v56  ;;  %v1021_v56 = vld [vmem:[%s1769_s8 + $0x8] sm:$0xff]  ;;  %v1023_v59 = vld [vmem:[%s1769_s8 + $0x18] sm:$0xff] }
 0x16b   :  { %v592_v8 = vadd.f32 %v591_v62, %v590_v54  ;;  %v605_v9 = vrot.slane %v604_v0, 2  ;;  %v617_v10 = vrot.slane %v616_v1, 4  ;;  %v624_v11 = vrot.slane %v623_v2, 4  ;;  %1248 = vmatmul.mubr.msk.f32.gmra.mrb[12].mxu0 %vm96_vm1, %v1321_v47  ;;  %v1209_v47 = vpop.f32.mrb[0].mxu0 }
 0x16c   :  { %v586_v12 = vrot.slane %v585_v5, 1  ;;  %v599_v13 = vadd.f32 %v598_v6, %v597_v60  ;;  %v612_v14 = vrot.slane %v611_v7, 2  ;;  %1250 = vmatprep.mubr.msk.f32.mxu0 %vm96_vm1, %v1323_v53  ;;  %v580_v19 = vadd.f32 %v579_v3, %v578_v58  ;;  %v218_v48 = vpop.f32.mrb[1].mxu0 }
 0x16d   :  { %v593_v15 = vrot.slane %v592_v8, 1  ;;  %v606_v16 = vadd.f32 %v605_v9, %v604_v0  ;;  %v618_v17 = vadd.f32 %v617_v10, %v616_v1  ;;  %v625_v18 = vadd.f32 %v624_v11, %v623_v2  ;;  %v1212_v49 = vpop.f32.mrb[2].mxu0  ;;  %v1124_v0 = vld [vmem:[%s1764_s3] ss:$0 sm:$0xff] }
 0x16e   :  { %v587_v20 = vadd.f32 %v586_v12, %v585_v5  ;;  %v600_v21 = vrot.slane %v599_v13, 1  ;;  %v613_v24 = vadd.f32 %v612_v14, %v611_v7  ;;  %v228_v51 = vpop.f32.mrb[3].mxu0  ;;  %v1456_v58 = vmov 0.0|0.0  }
 0x16f   :  { %v594_v25 = vadd.f32 %v593_v15, %v592_v8  ;;  %v607_v27 = vrot.slane %v606_v16, 1  ;;  %v619_v29 = vrot.slane %v618_v17, 2  ;;  %v626_v30 = vrot.slane %v625_v18, 2  ;;  %1251 = vmatmul.mubr.msk.f32.gmra.mrb[14].mxu0 %vm96_vm1, %v1325_v57  ;;  %v1215_v52 = vpop.f32.mrb[4].mxu0  ;;  %1290 = vmatprep.subr.bf16.mxu1 %v1456_v58 }
 0x170   :  { %v601_v28 = vadd.f32 %v600_v21, %v599_v13  ;;  %v614_v31 = vrot.slane %v613_v24, 1  ;;  %v638_v32 = vsel %vm439_vm4, %v587_v20, %v580_v19  ;;  %v238_v53 = vpop.f32.mrb[5].mxu0  ;;  %v1291_v57 = vpack.c.bf16 %v1021_v56, %v1020_v55 }
 0x171   :  { %v608_v33 = vadd.f32 %v607_v27, %v606_v16  ;;  %v620_v35 = vadd.f32 %v619_v29, %v618_v17  ;;  %v627_v26 = vadd.f32 %v626_v30, %v625_v18  ;;  %v639_v50 = vsel %vm441_vm5, %v594_v25, %v638_v32  ;;  %v1218_v37 = vpop.f32.mrb[6].mxu0 }
 0x172   :  { %v615_v36 = vadd.f32 %v614_v31, %v613_v24  ;;  %v640_v34 = vsel %vm443_vm6, %v601_v28, %v639_v50  ;;  %v248_v54 = vpop.f32.mrb[7].mxu0  ;;  %v224_v1 = vadd.f32 %v1209_v47, %v1124_v0  ;;  %v219_v2 = vadd.f32 %v1124_v0, %v218_v48 }
 0x173   :  { %v621_v46 = vrot.slane %v620_v35, 1  ;;  %v628_v63 = vrot.slane %v627_v26, 1  ;;  %v641_v4 = vsel %vm445_vm7, %v608_v33, %v640_v34  ;;  %v234_v8 = vadd.f32 %v1212_v49, %v1124_v0 }
 0x174   :  { %v642_v39 = vsel %vm447_vm8, %v615_v36, %v641_v4  ;;  %v229_v10 = vadd.f32 %v1124_v0, %v228_v51  ;;  %v244_v19 = vadd.f32 %v1215_v52, %v1124_v0  ;;  %v239_v24 = vadd.f32 %v1124_v0, %v238_v53 }
 0x175   :  { %v622_v40 = vadd.f32 %v621_v46, %v620_v35  ;;  %v629_v22 = vadd.f32 %v628_v63, %v627_v26  ;;  %v254_v35 = vadd.f32 %v1218_v37, %v1124_v0  ;;  %v249_v34 = vadd.f32 %v1124_v0, %v248_v54 }
 0x177   :  { %v643_v42 = vsel %vm449_vm9, %v622_v40, %v642_v39 }
 0x178   :  { %v644_v43 = vsel %vm451_vm10, %v629_v22, %v643_v42 }
 0x179   :  { %v646_v44 = vadd.f32 %v644_v43, %v573_v41 }
 0x17b   :  { %647 = vst.msk [vmem:[#allocation3] sm:$0xff] %vm96_vm1, %v646_v44 }
 0x182   :  { %v943_v45 = vld [vmem:[#allocation3] sm:$0xff] }
 0x183   :  { %1261 = vmatmul.mubr.msk.f32.vlgmr.msra.gmra.mrb[10].mxu1 %vm96_vm1, %v943_v45 }
 0x184   :  { %1271 = vmatprep.mubr.msk.f32.mxu1 %vm1454_vm3, %v1453_v23  ;;  %1292 = vmatpush3.bf16.msra.mxu1 %v1291_v57  ;;  %v1022_v23 = vld [vmem:[%s1769_s8 + $0x10] sm:$0xff] }
 0x185   :  { %1293 = vmatprep.subr.bf16.mxu1 %v1456_v58  ;;  %v1294_v60 = vpack.c.bf16 %v1023_v59, %v1022_v23 }
 0x188   :  { %1295 = vmatpush3.bf16.msra.mxu1 %v1294_v60 }
 0x22d   :  { %v1722_v61 = vpop.f32.mrb[8].mxu1 }
 0x22e   :  { %v1257_v62 = vpop.f32.mrb[9].mxu1 }
 0x236   :  { %v1243_v3 = vpop.f32.mrb[8].mxu0 }
 0x237   :  { %v858_v5 = vmul.f32 %v1243_v3, %v224_v1  ;;  %v743_v6 = vpop.f32.mrb[9].mxu0 }
 0x238   :  { %v857_v7 = vmul.f32 %v743_v6, %v219_v2 }
 0x239   :  { %v872_v9 = vsel %vm106_vm0, %v858_v5, 0.0 }
 0x23a   :  { %v873_v11 = vrot.slane %v872_v9, 4  ;;  %v865_v12 = vsel %vm106_vm0, %v857_v7, 0.0  ;;  %v1246_v13 = vpop.f32.mrb[10].mxu0 }
 0x23b   :  { %v866_v14 = vrot.slane %v865_v12, 4  ;;  %v860_v15 = vmul.f32 %v1246_v13, %v234_v8  ;;  %v753_v16 = vpop.f32.mrb[11].mxu0 }
 0x23c   :  { %v874_v17 = vadd.f32 %v873_v11, %v872_v9  ;;  %v859_v18 = vmul.f32 %v753_v16, %v229_v10 }
 0x23d   :  { %v867_v20 = vadd.f32 %v866_v14, %v865_v12  ;;  %v886_v21 = vsel %vm106_vm0, %v860_v15, 0.0 }
 0x23e   :  { %v875_v25 = vrot.slane %v874_v17, 2  ;;  %v887_v27 = vrot.slane %v886_v21, 4  ;;  %v879_v29 = vsel %vm106_vm0, %v859_v18, 0.0  ;;  %v1249_v30 = vpop.f32.mrb[12].mxu0 }
 0x23f   :  { %v868_v28 = vrot.slane %v867_v20, 2  ;;  %v880_v31 = vrot.slane %v879_v29, 4  ;;  %v862_v32 = vmul.f32 %v1249_v30, %v244_v19  ;;  %v763_v33 = vpop.f32.mrb[13].mxu0 }
 0x240   :  { %v876_v26 = vadd.f32 %v875_v25, %v874_v17  ;;  %v888_v50 = vadd.f32 %v887_v27, %v886_v21  ;;  %v861_v36 = vmul.f32 %v763_v33, %v239_v24  ;;  %v855_v21 = vld [vmem:[#allocation4] sm:$0xff] }
 0x241   :  { %v869_v46 = vadd.f32 %v868_v28, %v867_v20  ;;  %v881_v63 = vadd.f32 %v880_v31, %v879_v29  ;;  %v900_v4 = vsel %vm106_vm0, %v862_v32, 0.0  ;;  %v856_v29 = vmul.f32 %v855_v21, %v1722_v61 }
 0x242   :  { %v877_v38 = vrot.slane %v876_v26, 1  ;;  %v889_v39 = vrot.slane %v888_v50, 2  ;;  %v901_v40 = vrot.slane %v900_v4, 4  ;;  %v893_v22 = vsel %vm106_vm0, %v861_v36, 0.0  ;;  %v1252_v41 = vpop.f32.mrb[14].mxu0 }
 0x243   :  { %v870_v42 = vrot.slane %v869_v46, 1  ;;  %v882_v43 = vrot.slane %v881_v63, 2  ;;  %v894_v44 = vrot.slane %v893_v22, 4  ;;  %v864_v45 = vmul.f32 %v1252_v41, %v254_v35  ;;  %v773_v47 = vpop.f32.mrb[15].mxu0  ;;  %v1155_v36 = vld [vmem:[%s1770_s9] ss:$0 sm:$0xff] }
 0x244   :  { %v878_v48 = vadd.f32 %v877_v38, %v876_v26  ;;  %v890_v49 = vadd.f32 %v889_v39, %v888_v50  ;;  %v902_v51 = vadd.f32 %v901_v40, %v900_v4  ;;  %v863_v52 = vmul.f32 %v773_v47, %v249_v34 }
 0x245   :  { %v871_v53 = vadd.f32 %v870_v42, %v869_v46  ;;  %v883_v37 = vadd.f32 %v882_v43, %v881_v63  ;;  %v895_v54 = vadd.f32 %v894_v44, %v893_v22  ;;  %v914_v55 = vsel %vm106_vm0, %v864_v45, 0.0 }
 0x246   :  { %v891_v56 = vrot.slane %v890_v49, 1  ;;  %v903_v57 = vrot.slane %v902_v51, 2  ;;  %v915_v58 = vrot.slane %v914_v55, 4  ;;  %v907_v23 = vsel %vm106_vm0, %v863_v52, 0.0 }
 0x247   :  { %v929_v59 = vsel %vm439_vm4, %v878_v48, %v871_v53  ;;  %v884_v60 = vrot.slane %v883_v37, 1  ;;  %v896_v62 = vrot.slane %v895_v54, 2  ;;  %v908_v0 = vrot.slane %v907_v23, 4 }
 0x248   :  { %v904_v1 = vadd.f32 %v903_v57, %v902_v51  ;;  %v916_v2 = vadd.f32 %v915_v58, %v914_v55  ;;  %v892_v7 = vadd.f32 %v891_v56, %v890_v49 }
 0x249   :  { %v885_v3 = vadd.f32 %v884_v60, %v883_v37  ;;  %v897_v5 = vadd.f32 %v896_v62, %v895_v54  ;;  %v909_v6 = vadd.f32 %v908_v0, %v907_v23 }
 0x24a   :  { %v905_v8 = vrot.slane %v904_v1, 1  ;;  %v917_v9 = vrot.slane %v916_v2, 2 }
 0x24b   :  { %v930_v10 = vsel %vm441_vm5, %v885_v3, %v929_v59  ;;  %v898_v11 = vrot.slane %v897_v5, 1  ;;  %v910_v12 = vrot.slane %v909_v6, 2 }
 0x24c   :  { %v931_v13 = vsel %vm443_vm6, %v892_v7, %v930_v10  ;;  %v918_v14 = vadd.f32 %v917_v9, %v916_v2  ;;  %v906_v17 = vadd.f32 %v905_v8, %v904_v1 }
 0x24d   :  { %v899_v15 = vadd.f32 %v898_v11, %v897_v5  ;;  %v911_v16 = vadd.f32 %v910_v12, %v909_v6 }
 0x24e   :  { %v919_v18 = vrot.slane %v918_v14, 1 }
 0x24f   :  { %v932_v19 = vsel %vm445_vm7, %v899_v15, %v931_v13  ;;  %v912_v20 = vrot.slane %v911_v16, 1 }
 0x250   :  { %v933_v24 = vsel %vm447_vm8, %v906_v17, %v932_v19  ;;  %v920_v27 = vadd.f32 %v919_v18, %v918_v14 }
 0x251   :  { %v913_v25 = vadd.f32 %v912_v20, %v911_v16 }
 0x253   :  { %v934_v30 = vsel %vm449_vm9, %v913_v25, %v933_v24 }
 0x254   :  { %v935_v28 = vsel %vm451_vm10, %v920_v27, %v934_v30 }
 0x255   :  { %v937_v31 = vadd.f32 %v935_v28, %v856_v29 }
 0x256   :  { %v1013_v32 = vpop.f32.mrb[10].mxu1 }
 0x257   :  { %938 = vst.msk [vmem:[#allocation4] sm:$0xff] %vm106_vm0, %v937_v31  ;;  %1326 = vrcp.f32 %v1013_v32  ;;  %v1262_v33 = vpop.f32.mrb[11].mxu1 }
 0x25e   :  { %v1018_v35 = vld [vmem:[#allocation4] sm:$0xff] }
 0x261   :  { %v1327_v26 = vpop.eup %1326 }
 0x262   :  { %v1019_v50 = vmul.f32 %v1327_v26, %v1018_v35 }
 0x264   :  { %1272 = vmatmul.mubr.msk.f32.vlgmr.msra.gmra.mrb[12].mxu1 %vm106_vm0, %v1019_v50 }
 0x337   :  { %v1100_v61 = vpop.f32.mrb[12].mxu1 }
 0x338   :  { %v1101_v34 = vadd.f32 %v1155_v36, %v1100_v61  ;;  %v1273_v46 = vpop.f32.mrb[13].mxu1 }
 0x33a   :  { %1104 = vst.msk [vmem:[#allocation13] sm:$0xff] %vm106_vm0, %v1101_v34 }
 0x33b   :  { %1427 = shalt.err (!%p1424_p8)
}
 0x33c   :  { %s1428_s7 = scalar_lea.hbm %s1771_s10, 128 }
 0x33d   :  { %p1429_p9 = scmp.ne.s32.totalorder %s1771_s10, %s1428_s7  ;;  %p1432_p10 = scmp.lt.u32.totalorder %s1428_s7, %s1771_s10 }
 0x33f   :  { %p1434_p11 = pnand %p1432_p10, %p1429_p9 }
 0x341   :  { %1437 = shalt.err (!%p1434_p11)
}
 0x342   :  { %1114 = dma.vmem_to_hbm [thread:$0]  %s1112_s25, 128, %s1771_s10, [#allocation7]  }
 0x343   :  { %1444 = dma.done.wait [#allocation7], 128  }
 0x344   :  { %1445 = vsyncadd [#allocation7], 4294967168 }
 0x345   :  { %1118 = vsyncpa [#allocation6], 1 }
 0x346   :  { %1119 = vsyncpa [#allocation9], 1 }
 0x347   :  { %1120 = vsyncpa [#allocation12], 1 }
 0x348   :  { %1121 = vsyncpa [#allocation7], 1 }

</bundles_post_ra>
